<compile_context>
chip_gen: v6e
topology: v6e:2x2x1
jax: 0.10.0
libtpu: 0.0.40
codegen_flags: <defaults>
</compile_context>

<pallas_src>
import functools

import jax
import jax.numpy as jnp
from jax.experimental import pallas as pl
from jax.experimental.pallas import tpu as pltpu

LANE = 128


def _round_up(n, m):
    return ((n + m - 1) // m) * m


def _sublane_multiple(dtype):
    # Packed-sublane tile height: 8 for 32-bit, 16 for bf16, 32 for int8/fp8.
    return max(8, 32 // jnp.dtype(dtype).itemsize)


def _physical_vmem_bytes():
    try:
        return int(pltpu.get_tpu_info().vmem_capacity_bytes)
    except Exception:
        return 64 * 1024 * 1024  # conservative default (v7x per-TC size)


def _num_tensorcores():
    # v7x (and v4/v5p megacore) parts expose 2 TensorCores per chip.
    try:
        kind = jax.devices()[0].device_kind.lower()
    except Exception:
        return 1
    for tag in ("7", "v4", "v5p"):
        if tag in kind:
            return 2
    return 1


def mlp_kernel(x_ref, w1_ref, b1_ref, w2_ref, b2_ref, w3_ref, b3_ref, o_ref):
    # fc1 + bias + ReLU: f32 accumulation on the MXU, fused epilogue on the VPU.
    h = jnp.dot(x_ref[...], w1_ref[...], preferred_element_type=jnp.float32)
    h = jnp.maximum(h + b1_ref[...], 0.0).astype(w2_ref.dtype)
    # fc2 + bias + ReLU
    h = jnp.dot(h, w2_ref[...], preferred_element_type=jnp.float32)
    h = jnp.maximum(h + b2_ref[...], 0.0).astype(w3_ref.dtype)
    # fc3 + bias
    y = jnp.dot(h, w3_ref[...], preferred_element_type=jnp.float32) + b3_ref[...]
    o_ref[...] = y.astype(o_ref.dtype)


def prepare_params(w1, b1, w2, b2, w3, b3, compute_dtype=jnp.bfloat16):
    """Pad every lane dim to a multiple of 128 and cast weights ONCE (at init).

    Doing this outside the per-call path keeps forward-pass HBM traffic at just
    the activations plus a single read of the already-padded weights.
    """
    in_size, hidden = w1.shape
    out_size = w3.shape[1]
    in_p = _round_up(in_size, LANE)
    hid_p = _round_up(hidden, LANE)
    out_p = _round_up(out_size, LANE)

    w1_p = jnp.pad(w1, ((0, in_p - in_size), (0, hid_p - hidden))).astype(compute_dtype)
    w2_p = jnp.pad(w2, ((0, hid_p - hidden), (0, hid_p - hidden))).astype(compute_dtype)
    w3_p = jnp.pad(w3, ((0, hid_p - hidden), (0, out_p - out_size))).astype(compute_dtype)
    # Biases stay f32 so the matmul epilogue (bias add + ReLU) is full precision.
    b1_p = jnp.pad(b1.reshape(1, -1), ((0, 0), (0, hid_p - hidden))).astype(jnp.float32)
    b2_p = jnp.pad(b2.reshape(1, -1), ((0, 0), (0, hid_p - hidden))).astype(jnp.float32)
    b3_p = jnp.pad(b3.reshape(1, -1), ((0, 0), (0, out_p - out_size))).astype(jnp.float32)
    return w1_p, b1_p, w2_p, b2_p, w3_p, b3_p


def _vmem_limit_bytes(block_b, in_p, hid_p, out_p, compute_dtype, out_dtype, weight_bufs):
    cb = jnp.dtype(compute_dtype).itemsize
    ob = jnp.dtype(out_dtype).itemsize
    # Resident constant-index weights & f32 biases (1 buffer when Buffered(1)).
    weights = weight_bufs * (
        (in_p * hid_p + hid_p * hid_p + hid_p * out_p) * cb + (2 * hid_p + out_p) * 4
    )
    # Streamed x / out tiles: double-buffered by the auto-pipeline.
    tiles = 2 * block_b * (in_p * cb + out_p * ob)
    # f32 intermediate activations held during a step.
    inter = 2 * block_b * hid_p * 4
    headroom = 2 * 1024 * 1024
    cap = max(_physical_vmem_bytes() - 8 * 1024 * 1024, 8 * 1024 * 1024)
    return int(min(max(weights + tiles + inter + headroom, 8 * 1024 * 1024), cap))


@functools.partial(
    jax.jit, static_argnames=("out_size", "block_b", "single_buffer_weights")
)
def mlp_forward(x, w1_p, b1_p, w2_p, b2_p, w3_p, b3_p, *, out_size,
                block_b=256, single_buffer_weights=True):
    B, in_size = x.shape
    in_p, hid_p = w1_p.shape
    out_p = w3_p.shape[1]
    compute_dtype = w1_p.dtype
    out_dtype = x.dtype

    # ---- batch tile ---------------------------------------------------------
    sub = _sublane_multiple(compute_dtype)
    n_tc = _num_tensorcores()
    b_rounded = _round_up(B, sub)
    blk = _round_up(min(block_b, b_rounded), sub)
    # Only force a split on multi-TensorCore parts (v7x / megacore): there the
    # "parallel" batch axis is sharded across cores.  On 1-TC chips a forced
    # split just halves MXU M-fill and adds a grid step.
    if n_tc > 1 and b_rounded // blk < n_tc and b_rounded >= n_tc * sub:
        blk = _round_up(pl.cdiv(b_rounded, n_tc), sub)
    B_p = _round_up(b_rounded, blk)
    grid = (B_p // blk,)

    x_p = jnp.pad(x, ((0, B_p - B), (0, in_p - in_size))).astype(compute_dtype)

    # Constant-index (weight / bias) operands: a single VMEM buffer suffices.
    use_buffered = single_buffer_weights and hasattr(pl, "Buffered")

    def resident(shape):
        if use_buffered:
            try:
                return pl.BlockSpec(shape, lambda i: (0, 0),
                                    pipeline_mode=pl.Buffered(1))
            except TypeError:
                pass
        return pl.BlockSpec(shape, lambda i: (0, 0))

    vmem_limit = _vmem_limit_bytes(
        blk, in_p, hid_p, out_p, compute_dtype, out_dtype,
        weight_bufs=1 if use_buffered else 2,
    )

    out_padded = pl.pallas_call(
        mlp_kernel,
        out_shape=jax.ShapeDtypeStruct((B_p, out_p), out_dtype),
        grid_spec=pltpu.PrefetchScalarGridSpec(
            num_scalar_prefetch=0,
            grid=grid,
            in_specs=[
                # streamed batch tile of the (padded, lane-dense) input
                pl.BlockSpec((blk, in_p), lambda i: (i, 0)),
                # weights / biases: resident every step (constant index map)
                resident((in_p, hid_p)),
                resident((1, hid_p)),
                resident((hid_p, hid_p)),
                resident((1, hid_p)),
                resident((hid_p, out_p)),
                resident((1, out_p)),
            ],
            # lane-dense (multiple-of-128 wide) output block -> unmasked stores
            out_specs=pl.BlockSpec((blk, out_p), lambda i: (i, 0)),
        ),
        compiler_params=pltpu.CompilerParams(
            dimension_semantics=("parallel",),
            vmem_limit_bytes=vmem_limit,
        ),
    )(x_p, w1_p, b1_p, w2_p, b2_p, w3_p, b3_p)

    # strip batch / lane padding
    return out_padded[:B, :out_size]


def init_params(key, input_size, hidden_size, output_size, dtype=jnp.float32):
    """Deterministic parameter init (Kaiming-uniform-like, nn.Linear shapes)."""
    ks = jax.random.split(key, 6)

    def lin(kw, kb, fan_in, fan_out):
        bound = 1.0 / (fan_in ** 0.5)
        # stored as (in, out) == PyTorch weight (out, in) transposed
        w = jax.random.uniform(kw, (fan_in, fan_out), dtype, -bound, bound)
        b = jax.random.uniform(kb, (1, fan_out), dtype, -bound, bound)
        return w, b

    w1, b1 = lin(ks[0], ks[1], input_size, hidden_size)
    w2, b2 = lin(ks[2], ks[3], hidden_size, hidden_size)
    w3, b3 = lin(ks[4], ks[5], hidden_size, output_size)
    return w1, b1, w2, b2, w3, b3


def reference_forward(x, w1, b1, w2, b2, w3, b3):
    h = jnp.maximum(x @ w1 + b1, 0.0)
    h = jnp.maximum(h @ w2 + b2, 0.0)
    return h @ w3 + b3


if __name__ == "__main__":
    # Small shapes consistent with Model(input_size, hidden_size, output_size).
    batch, input_size, hidden_size, output_size = 8, 16, 32, 4

    key = jax.random.PRNGKey(0)
    kx, kp = jax.random.split(key)
    x = jax.random.normal(kx, (batch, input_size), jnp.float32)
    params = init_params(kp, input_size, hidden_size, output_size)
    ref = reference_forward(x, *params)

    def run(x_in, prepared):
        try:
            return jax.block_until_ready(
                mlp_forward(x_in, *prepared, out_size=output_size,
                            single_buffer_weights=True))
        except Exception:
            # Fallback if pipeline_mode=pl.Buffered(1) is unsupported here.
            return jax.block_until_ready(
                mlp_forward(x_in, *prepared, out_size=output_size,
                            single_buffer_weights=False))

    # f32 path — must match the reference tightly.
    prepared_f32 = prepare_params(*params, compute_dtype=jnp.float32)
    out = run(x, prepared_f32)
    assert out.shape == (batch, output_size)
    assert jnp.allclose(out, ref, atol=1e-5, rtol=1e-5)

    # bf16-operand / f32-accumulate fast path (default) — loose tolerance.
    prepared_bf16 = prepare_params(*params)  # compute_dtype=bf16 by default
    out_bf16 = run(x, prepared_bf16)
    assert out_bf16.shape == (batch, output_size)
    assert jnp.allclose(out_bf16, ref, atol=1e-1, rtol=1e-1)

    print("KERNEL_OK")
</pallas_src>

<mosaic_0001>
module attributes {stable_mosaic.version = 11 : i64} {
  func.func @mlp_kernel(%arg0: i32, %arg1: memref<8x128xf32, #tpu.memory_space<vmem>>, %arg2: memref<128x128xf32, #tpu.memory_space<vmem>>, %arg3: memref<1x128xf32, #tpu.memory_space<vmem>>, %arg4: memref<128x128xf32, #tpu.memory_space<vmem>>, %arg5: memref<1x128xf32, #tpu.memory_space<vmem>>, %arg6: memref<128x128xf32, #tpu.memory_space<vmem>>, %arg7: memref<1x128xf32, #tpu.memory_space<vmem>>, %arg8: memref<8x128xf32, #tpu.memory_space<vmem>>) attributes {dimension_semantics = [#tpu.dimension_semantics<parallel>], iteration_bounds = array<i64: 1>, scalar_prefetch = 0 : i64, scratch_operands = 0 : i64, tpu.core_type = #tpu.core_type<tc>, window_params = [{transform_indices = @transform_0, window_bounds = array<i64: 8, 128>}, {pipeline_mode = #tpu.pipeline_mode<synchronous>, transform_indices = @transform_1, window_bounds = array<i64: 128, 128>}, {pipeline_mode = #tpu.pipeline_mode<synchronous>, transform_indices = @transform_2, window_bounds = array<i64: 1, 128>}, {pipeline_mode = #tpu.pipeline_mode<synchronous>, transform_indices = @transform_3, window_bounds = array<i64: 128, 128>}, {pipeline_mode = #tpu.pipeline_mode<synchronous>, transform_indices = @transform_4, window_bounds = array<i64: 1, 128>}, {pipeline_mode = #tpu.pipeline_mode<synchronous>, transform_indices = @transform_5, window_bounds = array<i64: 128, 128>}, {pipeline_mode = #tpu.pipeline_mode<synchronous>, transform_indices = @transform_6, window_bounds = array<i64: 1, 128>}, {transform_indices = @transform_7, window_bounds = array<i64: 8, 128>}]} {
    %c0 = arith.constant 0 : index
    %c0_0 = arith.constant 0 : index
    %0 = vector.load %arg1[%c0, %c0_0] : memref<8x128xf32, #tpu.memory_space<vmem>>, vector<8x128xf32>
    %c0_1 = arith.constant 0 : index
    %c0_2 = arith.constant 0 : index
    %1 = vector.load %arg2[%c0_1, %c0_2] : memref<128x128xf32, #tpu.memory_space<vmem>>, vector<128x128xf32>
    %cst = arith.constant dense<0.000000e+00> : vector<8x128xf32>
    %2 = tpu.matmul %0, %1, %cst {dimension_numbers = #tpu.dot_dimension_numbers<[1], [0], [0], [1], [0, 0, 1, 1], [], []>} : vector<8x128xf32>, vector<128x128xf32>, vector<8x128xf32> -> vector<8x128xf32>
    %c0_3 = arith.constant 0 : index
    %c0_4 = arith.constant 0 : index
    %3 = vector.load %arg3[%c0_3, %c0_4] : memref<1x128xf32, #tpu.memory_space<vmem>>, vector<1x128xf32>
    %4 = vector.broadcast %3 : vector<1x128xf32> to vector<8x128xf32>
    %5 = arith.addf %2, %4 : vector<8x128xf32>
    %cst_5 = arith.constant 0.000000e+00 : f32
    %6 = vector.broadcast %cst_5 : f32 to vector<8x128xf32>
    %7 = arith.maximumf %5, %6 : vector<8x128xf32>
    %c0_6 = arith.constant 0 : index
    %c0_7 = arith.constant 0 : index
    %8 = vector.load %arg4[%c0_6, %c0_7] : memref<128x128xf32, #tpu.memory_space<vmem>>, vector<128x128xf32>
    %cst_8 = arith.constant dense<0.000000e+00> : vector<8x128xf32>
    %9 = tpu.matmul %7, %8, %cst_8 {dimension_numbers = #tpu.dot_dimension_numbers<[1], [0], [0], [1], [0, 0, 1, 1], [], []>} : vector<8x128xf32>, vector<128x128xf32>, vector<8x128xf32> -> vector<8x128xf32>
    %c0_9 = arith.constant 0 : index
    %c0_10 = arith.constant 0 : index
    %10 = vector.load %arg5[%c0_9, %c0_10] : memref<1x128xf32, #tpu.memory_space<vmem>>, vector<1x128xf32>
    %11 = vector.broadcast %10 : vector<1x128xf32> to vector<8x128xf32>
    %12 = arith.addf %9, %11 : vector<8x128xf32>
    %cst_11 = arith.constant 0.000000e+00 : f32
    %13 = vector.broadcast %cst_11 : f32 to vector<8x128xf32>
    %14 = arith.maximumf %12, %13 : vector<8x128xf32>
    %c0_12 = arith.constant 0 : index
    %c0_13 = arith.constant 0 : index
    %15 = vector.load %arg6[%c0_12, %c0_13] : memref<128x128xf32, #tpu.memory_space<vmem>>, vector<128x128xf32>
    %cst_14 = arith.constant dense<0.000000e+00> : vector<8x128xf32>
    %16 = tpu.matmul %14, %15, %cst_14 {dimension_numbers = #tpu.dot_dimension_numbers<[1], [0], [0], [1], [0, 0, 1, 1], [], []>} : vector<8x128xf32>, vector<128x128xf32>, vector<8x128xf32> -> vector<8x128xf32>
    %c0_15 = arith.constant 0 : index
    %c0_16 = arith.constant 0 : index
    %17 = vector.load %arg7[%c0_15, %c0_16] : memref<1x128xf32, #tpu.memory_space<vmem>>, vector<1x128xf32>
    %18 = vector.broadcast %17 : vector<1x128xf32> to vector<8x128xf32>
    %19 = arith.addf %16, %18 : vector<8x128xf32>
    %c0_17 = arith.constant 0 : index
    %c0_18 = arith.constant 0 : index
    %20 = vector.load %arg8[%c0_17, %c0_18] : memref<8x128xf32, #tpu.memory_space<vmem>>, vector<8x128xf32>
    tpu.vector_store %arg8[%c0_17, %c0_18], %19 {strides = array<i32>} : memref<8x128xf32, #tpu.memory_space<vmem>>, vector<8x128xf32>,
    return
  }
  func.func @transform_0(%arg0: i32) -> (i32, i32) {
    %c0_i32 = arith.constant 0 : i32
    %c0_i32_0 = arith.constant 0 : i32
    return %arg0, %c0_i32 : i32, i32
  }
  func.func @transform_1(%arg0: i32) -> (i32, i32) {
    %c0_i32 = arith.constant 0 : i32
    %c0_i32_0 = arith.constant 0 : i32
    %c0_i32_1 = arith.constant 0 : i32
    return %c0_i32, %c0_i32_0 : i32, i32
  }
  func.func @transform_2(%arg0: i32) -> (i32, i32) {
    %c0_i32 = arith.constant 0 : i32
    %c0_i32_0 = arith.constant 0 : i32
    %c0_i32_1 = arith.constant 0 : i32
    return %c0_i32, %c0_i32_0 : i32, i32
  }
  func.func @transform_3(%arg0: i32) -> (i32, i32) {
    %c0_i32 = arith.constant 0 : i32
    %c0_i32_0 = arith.constant 0 : i32
    %c0_i32_1 = arith.constant 0 : i32
    return %c0_i32, %c0_i32_0 : i32, i32
  }
  func.func @transform_4(%arg0: i32) -> (i32, i32) {
    %c0_i32 = arith.constant 0 : i32
    %c0_i32_0 = arith.constant 0 : i32
    %c0_i32_1 = arith.constant 0 : i32
    return %c0_i32, %c0_i32_0 : i32, i32
  }
  func.func @transform_5(%arg0: i32) -> (i32, i32) {
    %c0_i32 = arith.constant 0 : i32
    %c0_i32_0 = arith.constant 0 : i32
    %c0_i32_1 = arith.constant 0 : i32
    return %c0_i32, %c0_i32_0 : i32, i32
  }
  func.func @transform_6(%arg0: i32) -> (i32, i32) {
    %c0_i32 = arith.constant 0 : i32
    %c0_i32_0 = arith.constant 0 : i32
    %c0_i32_1 = arith.constant 0 : i32
    return %c0_i32, %c0_i32_0 : i32, i32
  }
  func.func @transform_7(%arg0: i32) -> (i32, i32) {
    %c0_i32 = arith.constant 0 : i32
    %c0_i32_0 = arith.constant 0 : i32
    return %arg0, %c0_i32 : i32, i32
  }
}

module attributes {stable_mosaic.version = 11 : i64} {
  func.func @mlp_kernel(%arg0: i32, %arg1: memref<8x128xf32, #tpu.memory_space<vmem>>, %arg2: memref<128x128xf32, #tpu.memory_space<vmem>>, %arg3: memref<1x128xf32, #tpu.memory_space<vmem>>, %arg4: memref<128x128xf32, #tpu.memory_space<vmem>>, %arg5: memref<1x128xf32, #tpu.memory_space<vmem>>, %arg6: memref<128x128xf32, #tpu.memory_space<vmem>>, %arg7: memref<1x128xf32, #tpu.memory_space<vmem>>, %arg8: memref<8x128xf32, #tpu.memory_space<vmem>>) attributes {dimension_semantics = [#tpu.dimension_semantics<parallel>], iteration_bounds = array<i64: 1>, scalar_prefetch = 0 : i64, scratch_operands = 0 : i64, tpu.core_type = #tpu.core_type<tc>, window_params = [{transform_indices = @transform_0, window_bounds = array<i64: 8, 128>}, {pipeline_mode = #tpu.pipeline_mode<synchronous>, transform_indices = @transform_1, window_bounds = array<i64: 128, 128>}, {pipeline_mode = #tpu.pipeline_mode<synchronous>, transform_indices = @transform_2, window_bounds = array<i64: 1, 128>}, {pipeline_mode = #tpu.pipeline_mode<synchronous>, transform_indices = @transform_3, window_bounds = array<i64: 128, 128>}, {pipeline_mode = #tpu.pipeline_mode<synchronous>, transform_indices = @transform_4, window_bounds = array<i64: 1, 128>}, {pipeline_mode = #tpu.pipeline_mode<synchronous>, transform_indices = @transform_5, window_bounds = array<i64: 128, 128>}, {pipeline_mode = #tpu.pipeline_mode<synchronous>, transform_indices = @transform_6, window_bounds = array<i64: 1, 128>}, {transform_indices = @transform_7, window_bounds = array<i64: 8, 128>}]} {
    %c0 = arith.constant 0 : index
    %c0_0 = arith.constant 0 : index
    %0 = vector.load %arg1[%c0, %c0_0] : memref<8x128xf32, #tpu.memory_space<vmem>>, vector<8x128xf32>
    %c0_1 = arith.constant 0 : index
    %c0_2 = arith.constant 0 : index
    %1 = vector.load %arg2[%c0_1, %c0_2] : memref<128x128xf32, #tpu.memory_space<vmem>>, vector<128x128xf32>
    %cst = arith.constant dense<0.000000e+00> : vector<8x128xf32>
    %2 = tpu.matmul %0, %1, %cst {dimension_numbers = #tpu.dot_dimension_numbers<[1], [0], [0], [1], [0, 0, 1, 1], [], []>} : vector<8x128xf32>, vector<128x128xf32>, vector<8x128xf32> -> vector<8x128xf32>
    %c0_3 = arith.constant 0 : index
    %c0_4 = arith.constant 0 : index
    %3 = vector.load %arg3[%c0_3, %c0_4] : memref<1x128xf32, #tpu.memory_space<vmem>>, vector<1x128xf32>
    %4 = vector.broadcast %3 : vector<1x128xf32> to vector<8x128xf32>
    %5 = arith.addf %2, %4 : vector<8x128xf32>
    %cst_5 = arith.constant 0.000000e+00 : f32
    %6 = vector.broadcast %cst_5 : f32 to vector<8x128xf32>
    %7 = arith.maximumf %5, %6 : vector<8x128xf32>
    %c0_6 = arith.constant 0 : index
    %c0_7 = arith.constant 0 : index
    %8 = vector.load %arg4[%c0_6, %c0_7] : memref<128x128xf32, #tpu.memory_space<vmem>>, vector<128x128xf32>
    %cst_8 = arith.constant dense<0.000000e+00> : vector<8x128xf32>
    %9 = tpu.matmul %7, %8, %cst_8 {dimension_numbers = #tpu.dot_dimension_numbers<[1], [0], [0], [1], [0, 0, 1, 1], [], []>} : vector<8x128xf32>, vector<128x128xf32>, vector<8x128xf32> -> vector<8x128xf32>
    %c0_9 = arith.constant 0 : index
    %c0_10 = arith.constant 0 : index
    %10 = vector.load %arg5[%c0_9, %c0_10] : memref<1x128xf32, #tpu.memory_space<vmem>>, vector<1x128xf32>
    %11 = vector.broadcast %10 : vector<1x128xf32> to vector<8x128xf32>
    %12 = arith.addf %9, %11 : vector<8x128xf32>
    %cst_11 = arith.constant 0.000000e+00 : f32
    %13 = vector.broadcast %cst_11 : f32 to vector<8x128xf32>
    %14 = arith.maximumf %12, %13 : vector<8x128xf32>
    %c0_12 = arith.constant 0 : index
    %c0_13 = arith.constant 0 : index
    %15 = vector.load %arg6[%c0_12, %c0_13] : memref<128x128xf32, #tpu.memory_space<vmem>>, vector<128x128xf32>
    %cst_14 = arith.constant dense<0.000000e+00> : vector<8x128xf32>
    %16 = tpu.matmul %14, %15, %cst_14 {dimension_numbers = #tpu.dot_dimension_numbers<[1], [0], [0], [1], [0, 0, 1, 1], [], []>} : vector<8x128xf32>, vector<128x128xf32>, vector<8x128xf32> -> vector<8x128xf32>
    %c0_15 = arith.constant 0 : index
    %c0_16 = arith.constant 0 : index
    %17 = vector.load %arg7[%c0_15, %c0_16] : memref<1x128xf32, #tpu.memory_space<vmem>>, vector<1x128xf32>
    %18 = vector.broadcast %17 : vector<1x128xf32> to vector<8x128xf32>
    %19 = arith.addf %16, %18 : vector<8x128xf32>
    %c0_17 = arith.constant 0 : index
    %c0_18 = arith.constant 0 : index
    %20 = vector.load %arg8[%c0_17, %c0_18] : memref<8x128xf32, #tpu.memory_space<vmem>>, vector<8x128xf32>
    tpu.vector_store %arg8[%c0_17, %c0_18], %19 {strides = array<i32>} : memref<8x128xf32, #tpu.memory_space<vmem>>, vector<8x128xf32>,
    return
  }
  func.func @transform_0(%arg0: i32) -> (i32, i32) {
    %c0_i32 = arith.constant 0 : i32
    %c0_i32_0 = arith.constant 0 : i32
    return %arg0, %c0_i32 : i32, i32
  }
  func.func @transform_1(%arg0: i32) -> (i32, i32) {
    %c0_i32 = arith.constant 0 : i32
    %c0_i32_0 = arith.constant 0 : i32
    %c0_i32_1 = arith.constant 0 : i32
    return %c0_i32, %c0_i32_0 : i32, i32
  }
  func.func @transform_2(%arg0: i32) -> (i32, i32) {
    %c0_i32 = arith.constant 0 : i32
    %c0_i32_0 = arith.constant 0 : i32
    %c0_i32_1 = arith.constant 0 : i32
    return %c0_i32, %c0_i32_0 : i32, i32
  }
  func.func @transform_3(%arg0: i32) -> (i32, i32) {
    %c0_i32 = arith.constant 0 : i32
    %c0_i32_0 = arith.constant 0 : i32
    %c0_i32_1 = arith.constant 0 : i32
    return %c0_i32, %c0_i32_0 : i32, i32
  }
  func.func @transform_4(%arg0: i32) -> (i32, i32) {
    %c0_i32 = arith.constant 0 : i32
    %c0_i32_0 = arith.constant 0 : i32
    %c0_i32_1 = arith.constant 0 : i32
    return %c0_i32, %c0_i32_0 : i32, i32
  }
  func.func @transform_5(%arg0: i32) -> (i32, i32) {
    %c0_i32 = arith.constant 0 : i32
    %c0_i32_0 = arith.constant 0 : i32
    %c0_i32_1 = arith.constant 0 : i32
    return %c0_i32, %c0_i32_0 : i32, i32
  }
  func.func @transform_6(%arg0: i32) -> (i32, i32) {
    %c0_i32 = arith.constant 0 : i32
    %c0_i32_0 = arith.constant 0 : i32
    %c0_i32_1 = arith.constant 0 : i32
    return %c0_i32, %c0_i32_0 : i32, i32
  }
  func.func @transform_7(%arg0: i32) -> (i32, i32) {
    %c0_i32 = arith.constant 0 : i32
    %c0_i32_0 = arith.constant 0 : i32
    return %arg0, %c0_i32 : i32, i32
  }
}

</mosaic_0001>

<bundles_post_ra>
// kernel: mlp_forward.1
= control target key start
LH: loop header
LB: loop body
LE: loop exit
PB: predicated region body
PF: predicated region fallthrough
CT: control target
= control target key end

     0   :  { %12 = vsyncpa [#allocation3], 0  ;;  %s711_s0 = inlined_call_operand.vmem [shape: f32[8,128], index: 0, kind: input, shape index: {}]   ;;  %s712_s1 = inlined_call_operand.hbm [shape: f32[128,128], index: 1, kind: input, shape index: {}]   ;;  %s713_s2 = inlined_call_operand.vmem [shape: f32[1,128], index: 2, kind: input, shape index: {}]   ;;  %s714_s3 = inlined_call_operand.hbm [shape: f32[128,128], index: 3, kind: input, shape index: {}]   ;;  %s715_s4 = inlined_call_operand.vmem [shape: f32[1,128], index: 4, kind: input, shape index: {}]   ;;  %s716_s5 = inlined_call_operand.hbm [shape: f32[128,128], index: 5, kind: input, shape index: {}]   ;;  %s717_s6 = inlined_call_operand.vmem [shape: f32[1,128], index: 6, kind: input, shape index: {}]   ;;  %s718_s7 = inlined_call_operand.vmem [shape: f32[8,128], index: 7, kind: output, shape index: {}]  }
   0x1   :  { %13 = vsyncpa [#allocation5], 0  ;;  %s586_s24 = smov [#allocation4]   ;;  %s587_s26 = smov [#allocation2]  }
   0x2   :  { %s35_s25 = sshll.u32 %s586_s24, 4  ;;  %s21_s27 = sshll.u32 %s587_s26, 4  ;;  %s36_s25 = int_to_ptr.vmem [resolvable:$true] %s35_s25  ;;  %s22_s27 = int_to_ptr.vmem [resolvable:$true] %s21_s27 }
   0x3   :  { %s530_s28 = scalar_lea.vmem %s36_s25, 2048  ;;  %p535_p1 = scmp.lt.s32.totalorder %s36_s25, %s36_s25 }
   0x4   :  { %p531_p0 = scmp.ne.s32.totalorder %s36_s25, %s530_s28  ;;  %p536_p2 = scmp.lt.s32.totalorder %s530_s28, %s530_s28 }
   0x6   :  { %p537_p3 = por %p536_p2, %p535_p1 }
   0x8   :  { %p538_p4 = pnand %p537_p3, %p531_p0 }
   0xa   :  { %541 = shalt.err (!%p538_p4)
}
   0xb   :  { %s588_s29 = smov 128   ;;  %s589_s30 = smov 8  }
   0xc   :  { %41 = dma.hbm_to_vmem [thread:$0]  %s714_s3, 2048, %s36_s25, [#allocation5], %s588_s29, %s588_s29, %s589_s30  }
   0xd   :  { %s550_s10 = scalar_lea.vmem %s22_s27, 2048  ;;  %p555_p6 = scmp.lt.s32.totalorder %s22_s27, %s22_s27 }
   0xe   :  { %p551_p5 = scmp.ne.s32.totalorder %s22_s27, %s550_s10  ;;  %p556_p7 = scmp.lt.s32.totalorder %s550_s10, %s550_s10 }
  0x10   :  { %p557_p8 = por %p556_p7, %p555_p6 }
  0x12   :  { %p558_p9 = pnand %p557_p8, %p551_p5 }
  0x14   :  { %561 = shalt.err (!%p558_p9)
}
  0x15   :  { %27 = dma.hbm_to_vmem [thread:$0]  %s712_s1, 2048, %s22_s27, [#allocation3], %s588_s29, %s588_s29, %s589_s30  }
  0x16   :  { %s590_s13 = smov [#allocation6]  }
  0x17   :  { %s49_s14 = sshll.u32 %s590_s13, 4  ;;  %s50_s14 = int_to_ptr.vmem [resolvable:$true] %s49_s14 }
  0x18   :  { %s570_s15 = scalar_lea.vmem %s50_s14, 2048  ;;  %p575_p11 = scmp.lt.s32.totalorder %s50_s14, %s50_s14 }
  0x19   :  { %p571_p10 = scmp.ne.s32.totalorder %s50_s14, %s570_s15  ;;  %p576_p12 = scmp.lt.s32.totalorder %s570_s15, %s570_s15 }
  0x1b   :  { %p577_p13 = por %p576_p12, %p575_p11 }
  0x1d   :  { %p578_p0 = pnand %p577_p13, %p571_p10 }
  0x1f   :  { %581 = shalt.err (!%p578_p0)
}
  0x20   :  { %55 = dma.hbm_to_vmem [thread:$0]  %s716_s5, 2048, %s50_s14, [#allocation5], %s588_s29, %s588_s29, %s589_s30  }
  0x21   :  { %582 = dma.done.wait [#allocation3], 2048  }
  0x22   :  { %583 = vsyncadd [#allocation3], 4294965248 }
  0x23   :  { %584 = dma.done.wait [#allocation5], 4096  }
  0x24   :  { %585 = vsyncadd [#allocation5], 4294963200  ;;  %v591_v0 = vmov 0.0   ;;  %vm592_vm0 = vmmov 0   ;;  %v83_v1 = vld [vmem:[#allocation2 + $0x78] sm:$0xff]  ;;  %v82_v2 = vld [vmem:[#allocation2 + $0x70] sm:$0xff] }
  0x25   :  { %410 = vmatprep.subr.mxu0 %v591_v0  ;;  %442 = vmatprep.mubr.msk.f32.mxu0 %vm592_vm0, %v591_v0  ;;  %v81_v3 = vld [vmem:[#allocation2 + $0x68] sm:$0xff]  ;;  %v80_v4 = vld [vmem:[#allocation2 + $0x60] sm:$0xff]  ;;  %v177_v5 = vld [vmem:[#allocation4 + $0x78] sm:$0xff] }
  0x26   :  { %445 = vmatprep.subr.mxu1 %v591_v0  ;;  %477 = vmatprep.mubr.msk.f32.mxu1 %vm592_vm0, %v591_v0  ;;  %v79_v6 = vld [vmem:[#allocation2 + $0x58] sm:$0xff]  ;;  %v176_v7 = vld [vmem:[#allocation4 + $0x70] sm:$0xff]  ;;  %v175_v8 = vld [vmem:[#allocation4 + $0x68] sm:$0xff] }
  0x27   :  { %411 = vmatpush3.msra.mxu0 %v83_v1  ;;  %446 = vmatpush3.msra.mxu1 %v177_v5  ;;  %v78_v9 = vld [vmem:[#allocation2 + $0x50] sm:$0xff]  ;;  %v174_v10 = vld [vmem:[#allocation4 + $0x60] sm:$0xff]  ;;  %v77_v11 = vld [vmem:[#allocation2 + $0x48] sm:$0xff] }
  0x28   :  { %412 = vmatprep.subr.mxu0 %v591_v0  ;;  %447 = vmatprep.subr.mxu1 %v591_v0  ;;  %v173_v12 = vld [vmem:[#allocation4 + $0x58] sm:$0xff]  ;;  %v76_v13 = vld [vmem:[#allocation2 + $0x40] sm:$0xff]  ;;  %v172_v14 = vld [vmem:[#allocation4 + $0x50] sm:$0xff] }
  0x29   :  { %413 = vmatpush3.msra.mxu0 %v82_v2  ;;  %448 = vmatpush3.msra.mxu1 %v176_v7  ;;  %v75_v15 = vld [vmem:[#allocation2 + $0x38] sm:$0xff]  ;;  %v171_v16 = vld [vmem:[#allocation4 + $0x48] sm:$0xff]  ;;  %v74_v17 = vld [vmem:[#allocation2 + $0x30] sm:$0xff] }
  0x2a   :  { %414 = vmatprep.subr.mxu0 %v591_v0  ;;  %449 = vmatprep.subr.mxu1 %v591_v0  ;;  %v170_v18 = vld [vmem:[#allocation4 + $0x40] sm:$0xff]  ;;  %v73_v19 = vld [vmem:[#allocation2 + $0x28] sm:$0xff]  ;;  %v169_v20 = vld [vmem:[#allocation4 + $0x38] sm:$0xff] }
  0x2b   :  { %415 = vmatpush3.msra.mxu0 %v81_v3  ;;  %450 = vmatpush3.msra.mxu1 %v175_v8  ;;  %v72_v21 = vld [vmem:[#allocation2 + $0x20] sm:$0xff]  ;;  %v168_v22 = vld [vmem:[#allocation4 + $0x30] sm:$0xff]  ;;  %v71_v23 = vld [vmem:[#allocation2 + $0x18] sm:$0xff] }
  0x2c   :  { %416 = vmatprep.subr.mxu0 %v591_v0  ;;  %451 = vmatprep.subr.mxu1 %v591_v0  ;;  %v167_v24 = vld [vmem:[#allocation4 + $0x28] sm:$0xff]  ;;  %v70_v25 = vld [vmem:[#allocation2 + $0x10] sm:$0xff]  ;;  %v166_v26 = vld [vmem:[#allocation4 + $0x20] sm:$0xff] }
  0x2d   :  { %417 = vmatpush3.msra.mxu0 %v80_v4  ;;  %452 = vmatpush3.msra.mxu1 %v174_v10  ;;  %v69_v27 = vld [vmem:[#allocation2 + $0x8] sm:$0xff]  ;;  %v165_v28 = vld [vmem:[#allocation4 + $0x18] sm:$0xff]  ;;  %v68_v29 = vld [vmem:[#allocation2] sm:$0xff] }
  0x2e   :  { %418 = vmatprep.subr.mxu0 %v591_v0  ;;  %453 = vmatprep.subr.mxu1 %v591_v0  ;;  %v67_v30 = vld [vmem:[%s711_s0] sm:$0xff]  ;;  %v164_v31 = vld [vmem:[#allocation4 + $0x10] sm:$0xff]  ;;  %v163_v32 = vld [vmem:[#allocation4 + $0x8] sm:$0xff] }
  0x2f   :  { %419 = vmatpush3.msra.mxu0 %v79_v6  ;;  %454 = vmatpush3.msra.mxu1 %v173_v12  ;;  %v162_v33 = vld [vmem:[#allocation4] sm:$0xff]  ;;  %v271_v34 = vld [vmem:[#allocation6 + $0x78] sm:$0xff]  ;;  %v270_v35 = vld [vmem:[#allocation6 + $0x70] sm:$0xff] }
  0x30   :  { %420 = vmatprep.subr.mxu0 %v591_v0  ;;  %455 = vmatprep.subr.mxu1 %v591_v0  ;;  %v269_v36 = vld [vmem:[#allocation6 + $0x68] sm:$0xff]  ;;  %v268_v37 = vld [vmem:[#allocation6 + $0x60] sm:$0xff]  ;;  %v267_v38 = vld [vmem:[#allocation6 + $0x58] sm:$0xff] }
  0x31   :  { %421 = vmatpush3.msra.mxu0 %v78_v9  ;;  %456 = vmatpush3.msra.mxu1 %v172_v14  ;;  %v266_v39 = vld [vmem:[#allocation6 + $0x50] sm:$0xff]  ;;  %v265_v40 = vld [vmem:[#allocation6 + $0x48] sm:$0xff]  ;;  %v264_v41 = vld [vmem:[#allocation6 + $0x40] sm:$0xff] }
  0x32   :  { %422 = vmatprep.subr.mxu0 %v591_v0  ;;  %457 = vmatprep.subr.mxu1 %v591_v0  ;;  %v263_v42 = vld [vmem:[#allocation6 + $0x38] sm:$0xff]  ;;  %v262_v43 = vld [vmem:[#allocation6 + $0x30] sm:$0xff]  ;;  %v261_v44 = vld [vmem:[#allocation6 + $0x28] sm:$0xff] }
  0x33   :  { %423 = vmatpush3.msra.mxu0 %v77_v11  ;;  %458 = vmatpush3.msra.mxu1 %v171_v16  ;;  %v260_v45 = vld [vmem:[#allocation6 + $0x20] sm:$0xff]  ;;  %v259_v46 = vld [vmem:[#allocation6 + $0x18] sm:$0xff]  ;;  %v258_v52 = vld [vmem:[#allocation6 + $0x10] sm:$0xff] }
  0x34   :  { %424 = vmatprep.subr.mxu0 %v591_v0  ;;  %459 = vmatprep.subr.mxu1 %v591_v0  ;;  %v356_v47 = vld [vmem:[%s713_s2] ss:$0 sm:$0xff]  ;;  %v257_v53 = vld [vmem:[#allocation6 + $0x8] sm:$0xff] }
  0x35   :  { %425 = vmatpush3.msra.mxu0 %v76_v13  ;;  %460 = vmatpush3.msra.mxu1 %v170_v18  ;;  %v256_v54 = vld [vmem:[#allocation6] sm:$0xff] }
  0x36   :  { %426 = vmatprep.subr.mxu0 %v591_v0  ;;  %461 = vmatprep.subr.mxu1 %v591_v0  ;;  %v357_v55 = vld [vmem:[%s715_s4] ss:$0 sm:$0xff] }
  0x37   :  { %427 = vmatpush3.msra.mxu0 %v75_v15  ;;  %462 = vmatpush3.msra.mxu1 %v169_v20  ;;  %v358_v60 = vld [vmem:[%s717_s6] ss:$0 sm:$0xff] }
  0x38   :  { %428 = vmatprep.subr.mxu0 %v591_v0  ;;  %463 = vmatprep.subr.mxu1 %v591_v0 }
  0x39   :  { %429 = vmatpush3.msra.mxu0 %v74_v17  ;;  %464 = vmatpush3.msra.mxu1 %v168_v22 }
  0x3a   :  { %430 = vmatprep.subr.mxu0 %v591_v0  ;;  %465 = vmatprep.subr.mxu1 %v591_v0 }
  0x3b   :  { %431 = vmatpush3.msra.mxu0 %v73_v19  ;;  %466 = vmatpush3.msra.mxu1 %v167_v24 }
  0x3c   :  { %432 = vmatprep.subr.mxu0 %v591_v0  ;;  %467 = vmatprep.subr.mxu1 %v591_v0 }
  0x3d   :  { %433 = vmatpush3.msra.mxu0 %v72_v21  ;;  %468 = vmatpush3.msra.mxu1 %v166_v26 }
  0x3e   :  { %434 = vmatprep.subr.mxu0 %v591_v0  ;;  %469 = vmatprep.subr.mxu1 %v591_v0 }
  0x3f   :  { %435 = vmatpush3.msra.mxu0 %v71_v23  ;;  %470 = vmatpush3.msra.mxu1 %v165_v28 }
  0x40   :  { %436 = vmatprep.subr.mxu0 %v591_v0  ;;  %471 = vmatprep.subr.mxu1 %v591_v0 }
  0x41   :  { %437 = vmatpush3.msra.mxu0 %v70_v25  ;;  %472 = vmatpush3.msra.mxu1 %v164_v31 }
  0x42   :  { %438 = vmatprep.subr.mxu0 %v591_v0  ;;  %473 = vmatprep.subr.mxu1 %v591_v0 }
  0x43   :  { %439 = vmatpush3.msra.mxu0 %v69_v27  ;;  %474 = vmatpush3.msra.mxu1 %v163_v32 }
  0x44   :  { %440 = vmatprep.subr.mxu0 %v591_v0  ;;  %475 = vmatprep.subr.mxu1 %v591_v0 }
  0x45   :  { %441 = vmatpush3.msra.mxu0 %v68_v29  ;;  %476 = vmatpush3.msra.mxu1 %v162_v33 }
  0x46   :  { %443 = vmatmul.mubr.f32.vlgmr.msra.gmra.mxu0 %v67_v30  ;;  %480 = vmatprep.subr.mxu0 %v591_v0 }
  0x47   :  { %512 = vmatprep.mubr.msk.f32.mxu0 %vm592_vm0, %v591_v0  ;;  %481 = vmatpush3.msra.mxu0 %v271_v34 }
  0x48   :  { %482 = vmatprep.subr.mxu0 %v591_v0 }
  0x49   :  { %483 = vmatpush3.msra.mxu0 %v270_v35 }
  0x4a   :  { %484 = vmatprep.subr.mxu0 %v591_v0 }
  0x4b   :  { %485 = vmatpush3.msra.mxu0 %v269_v36 }
  0x4c   :  { %486 = vmatprep.subr.mxu0 %v591_v0 }
  0x4d   :  { %487 = vmatpush3.msra.mxu0 %v268_v37 }
  0x4e   :  { %488 = vmatprep.subr.mxu0 %v591_v0 }
  0x4f   :  { %489 = vmatpush3.msra.mxu0 %v267_v38 }
  0x50   :  { %490 = vmatprep.subr.mxu0 %v591_v0 }
  0x51   :  { %491 = vmatpush3.msra.mxu0 %v266_v39 }
  0x52   :  { %492 = vmatprep.subr.mxu0 %v591_v0 }
  0x53   :  { %493 = vmatpush3.msra.mxu0 %v265_v40 }
  0x54   :  { %494 = vmatprep.subr.mxu0 %v591_v0 }
  0x55   :  { %495 = vmatpush3.msra.mxu0 %v264_v41 }
  0x56   :  { %496 = vmatprep.subr.mxu0 %v591_v0 }
  0x57   :  { %497 = vmatpush3.msra.mxu0 %v263_v42 }
  0x58   :  { %498 = vmatprep.subr.mxu0 %v591_v0 }
  0x59   :  { %499 = vmatpush3.msra.mxu0 %v262_v43 }
  0x5a   :  { %500 = vmatprep.subr.mxu0 %v591_v0 }
  0x5b   :  { %501 = vmatpush3.msra.mxu0 %v261_v44 }
  0x5c   :  { %502 = vmatprep.subr.mxu0 %v591_v0 }
  0x5d   :  { %503 = vmatpush3.msra.mxu0 %v260_v45 }
  0x5e   :  { %504 = vmatprep.subr.mxu0 %v591_v0 }
  0x5f   :  { %505 = vmatpush3.msra.mxu0 %v259_v46 }
  0x60   :  { %506 = vmatprep.subr.mxu0 %v591_v0 }
  0x61   :  { %507 = vmatpush3.msra.mxu0 %v258_v52 }
  0x62   :  { %508 = vmatprep.subr.mxu0 %v591_v0 }
  0x63   :  { %509 = vmatpush3.msra.mxu0 %v257_v53 }
  0x64   :  { %510 = vmatprep.subr.mxu0 %v591_v0 }
  0x65   :  { %511 = vmatpush3.msra.mxu0 %v256_v54 }
 0x106   :  { %v157_v48 = vpop.f32.mrf.mxu0 }
 0x107   :  { %v158_v49 = vadd.f32 %v356_v47, %v157_v48 }
 0x108   :  { %v444_v50 = vpop.f32.mrf.mxu0 }
 0x109   :  { %v161_v51 = vmax.f32 %v158_v49, 0.0 }
 0x10b   :  { %478 = vmatmul.mubr.f32.vlgmr.msra.gmra.mxu1 %v161_v51 }
 0x1cb   :  { %v251_v56 = vpop.f32.mrf.mxu1 }
 0x1cc   :  { %v252_v57 = vadd.f32 %v357_v55, %v251_v56 }
 0x1cd   :  { %v479_v58 = vpop.f32.mrf.mxu1 }
 0x1ce   :  { %v255_v59 = vmax.f32 %v252_v57, 0.0 }
 0x1d0   :  { %513 = vmatmul.mubr.f32.vlgmr.msra.gmra.mxu0 %v255_v59 }
 0x290   :  { %v345_v61 = vpop.f32.mrf.mxu0 }
 0x291   :  { %v346_v62 = vadd.f32 %v358_v60, %v345_v61 }
 0x292   :  { %v514_v63 = vpop.f32.mrf.mxu0 }
 0x293   :  { %349 = vst [vmem:[%s718_s7] sm:$0xff] %v346_v62 }
 0x294   :  { %354 = vsyncpa [#allocation3], 1 }
 0x295   :  { %355 = vsyncpa [#allocation5], 1 }

// kernel: mlp_forward.1
= control target key start
LH: loop header
LB: loop body
LE: loop exit
PB: predicated region body
PF: predicated region fallthrough
CT: control target
= control target key end

     0   :  { %12 = vsyncpa [#allocation3], 0  ;;  %s711_s0 = inlined_call_operand.vmem [shape: f32[8,128], index: 0, kind: input, shape index: {}]   ;;  %s712_s1 = inlined_call_operand.hbm [shape: f32[128,128], index: 1, kind: input, shape index: {}]   ;;  %s713_s2 = inlined_call_operand.vmem [shape: f32[1,128], index: 2, kind: input, shape index: {}]   ;;  %s714_s3 = inlined_call_operand.hbm [shape: f32[128,128], index: 3, kind: input, shape index: {}]   ;;  %s715_s4 = inlined_call_operand.vmem [shape: f32[1,128], index: 4, kind: input, shape index: {}]   ;;  %s716_s5 = inlined_call_operand.hbm [shape: f32[128,128], index: 5, kind: input, shape index: {}]   ;;  %s717_s6 = inlined_call_operand.vmem [shape: f32[1,128], index: 6, kind: input, shape index: {}]   ;;  %s718_s7 = inlined_call_operand.vmem [shape: f32[8,128], index: 7, kind: output, shape index: {}]  }
   0x1   :  { %13 = vsyncpa [#allocation5], 0  ;;  %s586_s24 = smov [#allocation4]   ;;  %s587_s26 = smov [#allocation2]  }
   0x2   :  { %s35_s25 = sshll.u32 %s586_s24, 4  ;;  %s21_s27 = sshll.u32 %s587_s26, 4  ;;  %s36_s25 = int_to_ptr.vmem [resolvable:$true] %s35_s25  ;;  %s22_s27 = int_to_ptr.vmem [resolvable:$true] %s21_s27 }
   0x3   :  { %s530_s28 = scalar_lea.vmem %s36_s25, 2048  ;;  %p535_p1 = scmp.lt.s32.totalorder %s36_s25, %s36_s25 }
   0x4   :  { %p531_p0 = scmp.ne.s32.totalorder %s36_s25, %s530_s28  ;;  %p536_p2 = scmp.lt.s32.totalorder %s530_s28, %s530_s28 }
   0x6   :  { %p537_p3 = por %p536_p2, %p535_p1 }
   0x8   :  { %p538_p4 = pnand %p537_p3, %p531_p0 }
   0xa   :  { %541 = shalt.err (!%p538_p4)
}
   0xb   :  { %s588_s29 = smov 128   ;;  %s589_s30 = smov 8  }
   0xc   :  { %41 = dma.hbm_to_vmem [thread:$0]  %s714_s3, 2048, %s36_s25, [#allocation5], %s588_s29, %s588_s29, %s589_s30  }
   0xd   :  { %s550_s10 = scalar_lea.vmem %s22_s27, 2048  ;;  %p555_p6 = scmp.lt.s32.totalorder %s22_s27, %s22_s27 }
   0xe   :  { %p551_p5 = scmp.ne.s32.totalorder %s22_s27, %s550_s10  ;;  %p556_p7 = scmp.lt.s32.totalorder %s550_s10, %s550_s10 }
  0x10   :  { %p557_p8 = por %p556_p7, %p555_p6 }
  0x12   :  { %p558_p9 = pnand %p557_p8, %p551_p5 }
  0x14   :  { %561 = shalt.err (!%p558_p9)
}
  0x15   :  { %27 = dma.hbm_to_vmem [thread:$0]  %s712_s1, 2048, %s22_s27, [#allocation3], %s588_s29, %s588_s29, %s589_s30  }
  0x16   :  { %s590_s13 = smov [#allocation6]  }
  0x17   :  { %s49_s14 = sshll.u32 %s590_s13, 4  ;;  %s50_s14 = int_to_ptr.vmem [resolvable:$true] %s49_s14 }
  0x18   :  { %s570_s15 = scalar_lea.vmem %s50_s14, 2048  ;;  %p575_p11 = scmp.lt.s32.totalorder %s50_s14, %s50_s14 }
  0x19   :  { %p571_p10 = scmp.ne.s32.totalorder %s50_s14, %s570_s15  ;;  %p576_p12 = scmp.lt.s32.totalorder %s570_s15, %s570_s15 }
  0x1b   :  { %p577_p13 = por %p576_p12, %p575_p11 }
  0x1d   :  { %p578_p0 = pnand %p577_p13, %p571_p10 }
  0x1f   :  { %581 = shalt.err (!%p578_p0)
}
  0x20   :  { %55 = dma.hbm_to_vmem [thread:$0]  %s716_s5, 2048, %s50_s14, [#allocation5], %s588_s29, %s588_s29, %s589_s30  }
  0x21   :  { %582 = dma.done.wait [#allocation3], 2048  }
  0x22   :  { %583 = vsyncadd [#allocation3], 4294965248 }
  0x23   :  { %584 = dma.done.wait [#allocation5], 4096  }
  0x24   :  { %585 = vsyncadd [#allocation5], 4294963200  ;;  %v591_v0 = vmov 0.0   ;;  %vm592_vm0 = vmmov 0   ;;  %v83_v1 = vld [vmem:[#allocation2 + $0x78] sm:$0xff]  ;;  %v82_v2 = vld [vmem:[#allocation2 + $0x70] sm:$0xff] }
  0x25   :  { %410 = vmatprep.subr.mxu0 %v591_v0  ;;  %442 = vmatprep.mubr.msk.f32.mxu0 %vm592_vm0, %v591_v0  ;;  %v81_v3 = vld [vmem:[#allocation2 + $0x68] sm:$0xff]  ;;  %v80_v4 = vld [vmem:[#allocation2 + $0x60] sm:$0xff]  ;;  %v177_v5 = vld [vmem:[#allocation4 + $0x78] sm:$0xff] }
  0x26   :  { %445 = vmatprep.subr.mxu1 %v591_v0  ;;  %477 = vmatprep.mubr.msk.f32.mxu1 %vm592_vm0, %v591_v0  ;;  %v79_v6 = vld [vmem:[#allocation2 + $0x58] sm:$0xff]  ;;  %v176_v7 = vld [vmem:[#allocation4 + $0x70] sm:$0xff]  ;;  %v175_v8 = vld [vmem:[#allocation4 + $0x68] sm:$0xff] }
  0x27   :  { %411 = vmatpush3.msra.mxu0 %v83_v1  ;;  %446 = vmatpush3.msra.mxu1 %v177_v5  ;;  %v78_v9 = vld [vmem:[#allocation2 + $0x50] sm:$0xff]  ;;  %v174_v10 = vld [vmem:[#allocation4 + $0x60] sm:$0xff]  ;;  %v77_v11 = vld [vmem:[#allocation2 + $0x48] sm:$0xff] }
  0x28   :  { %412 = vmatprep.subr.mxu0 %v591_v0  ;;  %447 = vmatprep.subr.mxu1 %v591_v0  ;;  %v173_v12 = vld [vmem:[#allocation4 + $0x58] sm:$0xff]  ;;  %v76_v13 = vld [vmem:[#allocation2 + $0x40] sm:$0xff]  ;;  %v172_v14 = vld [vmem:[#allocation4 + $0x50] sm:$0xff] }
  0x29   :  { %413 = vmatpush3.msra.mxu0 %v82_v2  ;;  %448 = vmatpush3.msra.mxu1 %v176_v7  ;;  %v75_v15 = vld [vmem:[#allocation2 + $0x38] sm:$0xff]  ;;  %v171_v16 = vld [vmem:[#allocation4 + $0x48] sm:$0xff]  ;;  %v74_v17 = vld [vmem:[#allocation2 + $0x30] sm:$0xff] }
  0x2a   :  { %414 = vmatprep.subr.mxu0 %v591_v0  ;;  %449 = vmatprep.subr.mxu1 %v591_v0  ;;  %v170_v18 = vld [vmem:[#allocation4 + $0x40] sm:$0xff]  ;;  %v73_v19 = vld [vmem:[#allocation2 + $0x28] sm:$0xff]  ;;  %v169_v20 = vld [vmem:[#allocation4 + $0x38] sm:$0xff] }
  0x2b   :  { %415 = vmatpush3.msra.mxu0 %v81_v3  ;;  %450 = vmatpush3.msra.mxu1 %v175_v8  ;;  %v72_v21 = vld [vmem:[#allocation2 + $0x20] sm:$0xff]  ;;  %v168_v22 = vld [vmem:[#allocation4 + $0x30] sm:$0xff]  ;;  %v71_v23 = vld [vmem:[#allocation2 + $0x18] sm:$0xff] }
  0x2c   :  { %416 = vmatprep.subr.mxu0 %v591_v0  ;;  %451 = vmatprep.subr.mxu1 %v591_v0  ;;  %v167_v24 = vld [vmem:[#allocation4 + $0x28] sm:$0xff]  ;;  %v70_v25 = vld [vmem:[#allocation2 + $0x10] sm:$0xff]  ;;  %v166_v26 = vld [vmem:[#allocation4 + $0x20] sm:$0xff] }
  0x2d   :  { %417 = vmatpush3.msra.mxu0 %v80_v4  ;;  %452 = vmatpush3.msra.mxu1 %v174_v10  ;;  %v69_v27 = vld [vmem:[#allocation2 + $0x8] sm:$0xff]  ;;  %v165_v28 = vld [vmem:[#allocation4 + $0x18] sm:$0xff]  ;;  %v68_v29 = vld [vmem:[#allocation2] sm:$0xff] }
  0x2e   :  { %418 = vmatprep.subr.mxu0 %v591_v0  ;;  %453 = vmatprep.subr.mxu1 %v591_v0  ;;  %v67_v30 = vld [vmem:[%s711_s0] sm:$0xff]  ;;  %v164_v31 = vld [vmem:[#allocation4 + $0x10] sm:$0xff]  ;;  %v163_v32 = vld [vmem:[#allocation4 + $0x8] sm:$0xff] }
  0x2f   :  { %419 = vmatpush3.msra.mxu0 %v79_v6  ;;  %454 = vmatpush3.msra.mxu1 %v173_v12  ;;  %v162_v33 = vld [vmem:[#allocation4] sm:$0xff]  ;;  %v271_v34 = vld [vmem:[#allocation6 + $0x78] sm:$0xff]  ;;  %v270_v35 = vld [vmem:[#allocation6 + $0x70] sm:$0xff] }
  0x30   :  { %420 = vmatprep.subr.mxu0 %v591_v0  ;;  %455 = vmatprep.subr.mxu1 %v591_v0  ;;  %v269_v36 = vld [vmem:[#allocation6 + $0x68] sm:$0xff]  ;;  %v268_v37 = vld [vmem:[#allocation6 + $0x60] sm:$0xff]  ;;  %v267_v38 = vld [vmem:[#allocation6 + $0x58] sm:$0xff] }
  0x31   :  { %421 = vmatpush3.msra.mxu0 %v78_v9  ;;  %456 = vmatpush3.msra.mxu1 %v172_v14  ;;  %v266_v39 = vld [vmem:[#allocation6 + $0x50] sm:$0xff]  ;;  %v265_v40 = vld [vmem:[#allocation6 + $0x48] sm:$0xff]  ;;  %v264_v41 = vld [vmem:[#allocation6 + $0x40] sm:$0xff] }
  0x32   :  { %422 = vmatprep.subr.mxu0 %v591_v0  ;;  %457 = vmatprep.subr.mxu1 %v591_v0  ;;  %v263_v42 = vld [vmem:[#allocation6 + $0x38] sm:$0xff]  ;;  %v262_v43 = vld [vmem:[#allocation6 + $0x30] sm:$0xff]  ;;  %v261_v44 = vld [vmem:[#allocation6 + $0x28] sm:$0xff] }
  0x33   :  { %423 = vmatpush3.msra.mxu0 %v77_v11  ;;  %458 = vmatpush3.msra.mxu1 %v171_v16  ;;  %v260_v45 = vld [vmem:[#allocation6 + $0x20] sm:$0xff]  ;;  %v259_v46 = vld [vmem:[#allocation6 + $0x18] sm:$0xff]  ;;  %v258_v52 = vld [vmem:[#allocation6 + $0x10] sm:$0xff] }
  0x34   :  { %424 = vmatprep.subr.mxu0 %v591_v0  ;;  %459 = vmatprep.subr.mxu1 %v591_v0  ;;  %v356_v47 = vld [vmem:[%s713_s2] ss:$0 sm:$0xff]  ;;  %v257_v53 = vld [vmem:[#allocation6 + $0x8] sm:$0xff] }
  0x35   :  { %425 = vmatpush3.msra.mxu0 %v76_v13  ;;  %460 = vmatpush3.msra.mxu1 %v170_v18  ;;  %v256_v54 = vld [vmem:[#allocation6] sm:$0xff] }
  0x36   :  { %426 = vmatprep.subr.mxu0 %v591_v0  ;;  %461 = vmatprep.subr.mxu1 %v591_v0  ;;  %v357_v55 = vld [vmem:[%s715_s4] ss:$0 sm:$0xff] }
  0x37   :  { %427 = vmatpush3.msra.mxu0 %v75_v15  ;;  %462 = vmatpush3.msra.mxu1 %v169_v20  ;;  %v358_v60 = vld [vmem:[%s717_s6] ss:$0 sm:$0xff] }
  0x38   :  { %428 = vmatprep.subr.mxu0 %v591_v0  ;;  %463 = vmatprep.subr.mxu1 %v591_v0 }
  0x39   :  { %429 = vmatpush3.msra.mxu0 %v74_v17  ;;  %464 = vmatpush3.msra.mxu1 %v168_v22 }
  0x3a   :  { %430 = vmatprep.subr.mxu0 %v591_v0  ;;  %465 = vmatprep.subr.mxu1 %v591_v0 }
  0x3b   :  { %431 = vmatpush3.msra.mxu0 %v73_v19  ;;  %466 = vmatpush3.msra.mxu1 %v167_v24 }
  0x3c   :  { %432 = vmatprep.subr.mxu0 %v591_v0  ;;  %467 = vmatprep.subr.mxu1 %v591_v0 }
  0x3d   :  { %433 = vmatpush3.msra.mxu0 %v72_v21  ;;  %468 = vmatpush3.msra.mxu1 %v166_v26 }
  0x3e   :  { %434 = vmatprep.subr.mxu0 %v591_v0  ;;  %469 = vmatprep.subr.mxu1 %v591_v0 }
  0x3f   :  { %435 = vmatpush3.msra.mxu0 %v71_v23  ;;  %470 = vmatpush3.msra.mxu1 %v165_v28 }
  0x40   :  { %436 = vmatprep.subr.mxu0 %v591_v0  ;;  %471 = vmatprep.subr.mxu1 %v591_v0 }
  0x41   :  { %437 = vmatpush3.msra.mxu0 %v70_v25  ;;  %472 = vmatpush3.msra.mxu1 %v164_v31 }
  0x42   :  { %438 = vmatprep.subr.mxu0 %v591_v0  ;;  %473 = vmatprep.subr.mxu1 %v591_v0 }
  0x43   :  { %439 = vmatpush3.msra.mxu0 %v69_v27  ;;  %474 = vmatpush3.msra.mxu1 %v163_v32 }
  0x44   :  { %440 = vmatprep.subr.mxu0 %v591_v0  ;;  %475 = vmatprep.subr.mxu1 %v591_v0 }
  0x45   :  { %441 = vmatpush3.msra.mxu0 %v68_v29  ;;  %476 = vmatpush3.msra.mxu1 %v162_v33 }
  0x46   :  { %443 = vmatmul.mubr.f32.vlgmr.msra.gmra.mxu0 %v67_v30  ;;  %480 = vmatprep.subr.mxu0 %v591_v0 }
  0x47   :  { %512 = vmatprep.mubr.msk.f32.mxu0 %vm592_vm0, %v591_v0  ;;  %481 = vmatpush3.msra.mxu0 %v271_v34 }
  0x48   :  { %482 = vmatprep.subr.mxu0 %v591_v0 }
  0x49   :  { %483 = vmatpush3.msra.mxu0 %v270_v35 }
  0x4a   :  { %484 = vmatprep.subr.mxu0 %v591_v0 }
  0x4b   :  { %485 = vmatpush3.msra.mxu0 %v269_v36 }
  0x4c   :  { %486 = vmatprep.subr.mxu0 %v591_v0 }
  0x4d   :  { %487 = vmatpush3.msra.mxu0 %v268_v37 }
  0x4e   :  { %488 = vmatprep.subr.mxu0 %v591_v0 }
  0x4f   :  { %489 = vmatpush3.msra.mxu0 %v267_v38 }
  0x50   :  { %490 = vmatprep.subr.mxu0 %v591_v0 }
  0x51   :  { %491 = vmatpush3.msra.mxu0 %v266_v39 }
  0x52   :  { %492 = vmatprep.subr.mxu0 %v591_v0 }
  0x53   :  { %493 = vmatpush3.msra.mxu0 %v265_v40 }
  0x54   :  { %494 = vmatprep.subr.mxu0 %v591_v0 }
  0x55   :  { %495 = vmatpush3.msra.mxu0 %v264_v41 }
  0x56   :  { %496 = vmatprep.subr.mxu0 %v591_v0 }
  0x57   :  { %497 = vmatpush3.msra.mxu0 %v263_v42 }
  0x58   :  { %498 = vmatprep.subr.mxu0 %v591_v0 }
  0x59   :  { %499 = vmatpush3.msra.mxu0 %v262_v43 }
  0x5a   :  { %500 = vmatprep.subr.mxu0 %v591_v0 }
  0x5b   :  { %501 = vmatpush3.msra.mxu0 %v261_v44 }
  0x5c   :  { %502 = vmatprep.subr.mxu0 %v591_v0 }
  0x5d   :  { %503 = vmatpush3.msra.mxu0 %v260_v45 }
  0x5e   :  { %504 = vmatprep.subr.mxu0 %v591_v0 }
  0x5f   :  { %505 = vmatpush3.msra.mxu0 %v259_v46 }
  0x60   :  { %506 = vmatprep.subr.mxu0 %v591_v0 }
  0x61   :  { %507 = vmatpush3.msra.mxu0 %v258_v52 }
  0x62   :  { %508 = vmatprep.subr.mxu0 %v591_v0 }
  0x63   :  { %509 = vmatpush3.msra.mxu0 %v257_v53 }
  0x64   :  { %510 = vmatprep.subr.mxu0 %v591_v0 }
  0x65   :  { %511 = vmatpush3.msra.mxu0 %v256_v54 }
 0x106   :  { %v157_v48 = vpop.f32.mrf.mxu0 }
 0x107   :  { %v158_v49 = vadd.f32 %v356_v47, %v157_v48 }
 0x108   :  { %v444_v50 = vpop.f32.mrf.mxu0 }
 0x109   :  { %v161_v51 = vmax.f32 %v158_v49, 0.0 }
 0x10b   :  { %478 = vmatmul.mubr.f32.vlgmr.msra.gmra.mxu1 %v161_v51 }
 0x1cb   :  { %v251_v56 = vpop.f32.mrf.mxu1 }
 0x1cc   :  { %v252_v57 = vadd.f32 %v357_v55, %v251_v56 }
 0x1cd   :  { %v479_v58 = vpop.f32.mrf.mxu1 }
 0x1ce   :  { %v255_v59 = vmax.f32 %v252_v57, 0.0 }
 0x1d0   :  { %513 = vmatmul.mubr.f32.vlgmr.msra.gmra.mxu0 %v255_v59 }
 0x290   :  { %v345_v61 = vpop.f32.mrf.mxu0 }
 0x291   :  { %v346_v62 = vadd.f32 %v358_v60, %v345_v61 }
 0x292   :  { %v514_v63 = vpop.f32.mrf.mxu0 }
 0x293   :  { %349 = vst [vmem:[%s718_s7] sm:$0xff] %v346_v62 }
 0x294   :  { %354 = vsyncpa [#allocation3], 1 }
 0x295   :  { %355 = vsyncpa [#allocation5], 1 }

</bundles_post_ra>
